<compile_context>
chip_gen: v7x
topology: tpu7x:2x2x1
jax: 0.10.0
libtpu: 0.0.40
codegen_flags: <defaults>
</compile_context>

<pallas_src>
import math
import functools

import jax
import jax.numpy as jnp
from jax import lax
from jax.experimental import pallas as pl
from jax.experimental.pallas import tpu as pltpu


# ---------------------------------------------------------------------------
# Parameter setup (mirrors Positional_Encoding.__init__)
# ---------------------------------------------------------------------------
def make_positional_encoding(d_model: int, max_len: int = 5000) -> jax.Array:
    """Returns pe with shape [max_len, 1, d_model] (float32), same as torch buffer."""
    position = jnp.arange(0, max_len, dtype=jnp.float32)[:, None]            # (L, 1)
    div_term = jnp.exp(
        jnp.arange(0, d_model, 2, dtype=jnp.float32) * (-math.log(10000.0) / d_model)
    )                                                                         # (D/2,)
    angles = position * div_term                                              # (L, D/2)
    pe = jnp.zeros((max_len, d_model), dtype=jnp.float32)
    pe = pe.at[:, 0::2].set(jnp.sin(angles))
    pe = pe.at[:, 1::2].set(jnp.cos(angles))
    return pe[:, None, :]                                                     # (L, 1, D)


# ---------------------------------------------------------------------------
# Kernels
# ---------------------------------------------------------------------------
def _bcast_pe(pe, b, three_d):
    # pe tile is (tile_s, D) float32.
    if three_d:
        return pe[:, None, :]                     # broadcast over batch: (ts, 1, D)
    if b == 1:
        return pe
    # x tile is (ts, B*D) with d fastest -> repeat pe row B times along lanes.
    return jnp.tile(pe, (1, b))


def _add_pe_kernel(x_ref, pe_ref, o_ref, *, b, three_d):
    pe = _bcast_pe(pe_ref[...], b, three_d)
    y = x_ref[...].astype(jnp.float32) + pe
    o_ref[...] = y.astype(o_ref.dtype)


def _add_pe_dropout_kernel(seed_ref, x_ref, pe_ref, o_ref, *,
                           b, three_d, threshold, scale, tile_elems):
    pe = _bcast_pe(pe_ref[...], b, three_d)
    y = x_ref[...].astype(jnp.float32) + pe

    # Stateless counter-based PRNG: globally-unique per-element counter mixed
    # with the seed through an avalanche hash (lowbias32-style).  No TPU-only
    # PRNG primitives -> also runs under interpret mode.
    shp = y.shape
    strides = pl.strides_from_shape(shp)
    idx = lax.broadcasted_iota(jnp.int32, shp, 0).astype(jnp.uint32) * jnp.uint32(strides[0])
    for d in range(1, len(shp)):
        idx = idx + (lax.broadcasted_iota(jnp.int32, shp, d).astype(jnp.uint32)
                     * jnp.uint32(strides[d]))
    counter = idx + pl.program_id(0).astype(jnp.uint32) * jnp.uint32(tile_elems)

    seed_u = seed_ref[0].astype(jnp.uint32)
    h = counter ^ (seed_u * jnp.uint32(0x9E3779B9))
    h = (h ^ (h >> jnp.uint32(16))) * jnp.uint32(0x7FEB352D)
    h = (h ^ (h >> jnp.uint32(15))) * jnp.uint32(0x846CA68B)
    h = h ^ (h >> jnp.uint32(16))

    r = (h >> jnp.uint32(1)).astype(jnp.int32)       # uniform in [0, 2^31)
    keep = r >= jnp.int32(threshold)                  # P(keep) = 1 - p
    o_ref[...] = jnp.where(keep, y * jnp.float32(scale), 0.0).astype(o_ref.dtype)


# ---------------------------------------------------------------------------
# Tiling heuristics
# ---------------------------------------------------------------------------
def _vmem_budget_bytes() -> int:
    """Scoped-VMEM budget: half the physical VMEM, capped at 64 MiB.
    v5e/v6e (128 MiB) -> 64 MiB; v7x (64 MiB) -> 32 MiB; fallback 32 MiB."""
    try:
        cap = int(getattr(pltpu.get_tpu_info(), "vmem_capacity_bytes",
                          64 * 1024 * 1024))
    except Exception:
        cap = 64 * 1024 * 1024
    return max(32 * 1024 * 1024, min(cap // 2, 64 * 1024 * 1024))


def _choose_tile_rows(S, row_elems, itemsize, target_bytes, min_steps=2):
    """Rows per block: ~target_bytes of x per block, >= min_steps grid steps when
    the sequence is long enough.  Blocks are a multiple of 8 rows (or full S)."""
    t = max(8, target_bytes // max(1, row_elems * itemsize))
    t = min(t, max(8, S // min_steps))
    t = min(t, S)
    if t < S:
        t = max(8, (t // 8) * 8)
    return int(t)


# ---------------------------------------------------------------------------
# Forward wrapper (== Positional_Encoding.forward)
# ---------------------------------------------------------------------------
def positional_encoding_forward(
    x: jax.Array,           # [seq_len, batch, d_model]
    pe: jax.Array,          # [max_len, 1, d_model] (float32 buffer)
    *,
    dropout_p: float = 0.1,
    training: bool = False,
    seed: int = 0,
) -> jax.Array:
    S, B, D = x.shape
    pe_sd = pe[:S, 0, :].astype(jnp.float32)        # (S, D) f32; broadcast in-kernel
    itemsize = jnp.dtype(x.dtype).itemsize

    budget = _vmem_budget_bytes()
    target_bytes = budget // 8                      # 2x(x)+2x(out) buffers fit w/ slack

    dense3d = (B % 8 == 0) and (D % 128 == 0)
    if dense3d:
        # Native 3-D layout: (B, D) fills sublanes/lanes densely.
        row_elems = B * D
        tile_s = _choose_tile_rows(S, row_elems, itemsize, target_bytes)
        x_in = x
        x_spec = pl.BlockSpec((tile_s, B, D), lambda i: (i, 0, 0))
        out_spec = pl.BlockSpec((tile_s, B, D), lambda i: (i, 0, 0))
        out_shape = jax.ShapeDtypeStruct((S, B, D), x.dtype)
        reshape_out = lambda o: o
        tile_elems = tile_s * B * D
        three_d = True
    else:
        # Lane-flattened fallback for small / unaligned (B, D): view x as (S, B*D).
        # pe stays (S, D) and is tiled across batch inside the kernel (no HBM blowup).
        # TODO(synk): if B*D is not a multiple of 128 the output stores are masked
        # (sub-128 lanes); fine for small shapes like the demo below.
        row = B * D
        x_in = x.reshape(S, row)
        tile_s = _choose_tile_rows(S, row, itemsize, target_bytes)
        x_spec = pl.BlockSpec((tile_s, row), lambda i: (i, 0))
        out_spec = pl.BlockSpec((tile_s, row), lambda i: (i, 0))
        out_shape = jax.ShapeDtypeStruct((S, row), x.dtype)
        reshape_out = lambda o: o.reshape(S, B, D)
        tile_elems = tile_s * row
        three_d = False

    pe_spec = pl.BlockSpec((tile_s, D), lambda i: (i, 0))
    grid = (pl.cdiv(S, tile_s),)
    cp = pltpu.CompilerParams(
        dimension_semantics=("parallel",),          # tiles independent -> TC sharding
        vmem_limit_bytes=budget,
    )

    if (not training) or dropout_p == 0.0:
        # eval mode: dropout is identity (matches nn.Dropout.eval())
        out = pl.pallas_call(
            functools.partial(_add_pe_kernel, b=B, three_d=three_d),
            out_shape=out_shape,
            grid=grid,
            in_specs=[x_spec, pe_spec],
            out_specs=out_spec,
            compiler_params=cp,
        )(x_in, pe_sd)
        return reshape_out(out)

    if dropout_p >= 1.0:
        return jnp.zeros_like(x)

    # training mode: inverted dropout, integer-threshold mask.
    # (Matches torch semantics distributionally, not bit-for-bit with torch RNG.)
    threshold = min(int(round(float(dropout_p) * (1 << 31))), (1 << 31) - 1)
    scale = 1.0 / (1.0 - float(dropout_p))
    seed_arr = jnp.asarray([seed], dtype=jnp.int32)
    out = pl.pallas_call(
        functools.partial(_add_pe_dropout_kernel, b=B, three_d=three_d,
                          threshold=threshold, scale=scale, tile_elems=tile_elems),
        out_shape=out_shape,
        grid=grid,
        in_specs=[
            pl.BlockSpec(memory_space=pltpu.MemorySpace.SMEM),   # seed scalar
            x_spec,
            pe_spec,
        ],
        out_specs=out_spec,
        compiler_params=cp,
    )(seed_arr, x_in, pe_sd)
    return reshape_out(out)


# ---------------------------------------------------------------------------
# Demo / self-test
# ---------------------------------------------------------------------------
if __name__ == "__main__":
    k1, k2 = jax.random.split(jax.random.PRNGKey(0), 2)

    # --- case 1: small unaligned shapes (B < 8, D % 128 != 0) -> 2-D flattened path
    S1, B1, D1 = 8, 2, 32
    pe1 = make_positional_encoding(D1, max_len=64)
    x1 = jax.random.normal(k1, (S1, B1, D1), dtype=jnp.float32)
    out1 = jax.block_until_ready(
        positional_encoding_forward(x1, pe1, dropout_p=0.1, training=False))
    ref1 = x1 + pe1[:S1]
    assert out1.shape == (S1, B1, D1)
    assert jnp.allclose(out1, ref1, atol=1e-6, rtol=1e-6), "2-D path mismatch"

    # --- case 2: aligned shapes (B % 8 == 0, D % 128 == 0) -> 3-D path, tiled grid
    S2, B2, D2 = 256, 8, 128
    pe2 = make_positional_encoding(D2, max_len=512)
    x2 = jax.random.normal(k2, (S2, B2, D2), dtype=jnp.float32)
    out2 = jax.block_until_ready(
        positional_encoding_forward(x2, pe2, dropout_p=0.1, training=False))
    ref2 = x2 + pe2[:S2]
    assert jnp.allclose(out2, ref2, atol=1e-6, rtol=1e-6), "3-D path mismatch"

    # --- case 3: training-mode dropout sanity check (p = 0.5)
    p = 0.5
    out3 = jax.block_until_ready(
        positional_encoding_forward(x2, pe2, dropout_p=p, training=True, seed=123))
    scaled = ref2 / (1.0 - p)
    is_zero = jnp.isclose(out3, 0.0, atol=1e-6)
    is_scaled = jnp.isclose(out3, scaled, atol=1e-4, rtol=1e-4)
    assert bool(jnp.all(is_zero | is_scaled)), "dropout values not in {0, y/(1-p)}"
    keep_frac = float(1.0 - jnp.mean(is_zero.astype(jnp.float32)))
    assert 0.4 < keep_frac < 0.6, f"unexpected keep fraction {keep_frac}"

    print("KERNEL_OK")
</pallas_src>

<mosaic_0001>
module attributes {stable_mosaic.version = 11 : i64} {
  func.func @_add_pe_kernel(%arg0: i32, %arg1: memref<8x64xf32, #tpu.memory_space<vmem>>, %arg2: memref<8x32xf32, #tpu.memory_space<vmem>>, %arg3: memref<8x64xf32, #tpu.memory_space<vmem>>) attributes {dimension_semantics = [#tpu.dimension_semantics<parallel>], iteration_bounds = array<i64: 1>, scalar_prefetch = 0 : i64, scratch_operands = 0 : i64, tpu.core_type = #tpu.core_type<tc>, window_params = [{transform_indices = @transform_0, window_bounds = array<i64: 8, 64>}, {transform_indices = @transform_1, window_bounds = array<i64: 8, 32>}, {transform_indices = @transform_2, window_bounds = array<i64: 8, 64>}]} {
    %c0 = arith.constant 0 : index
    %c0_0 = arith.constant 0 : index
    %0 = vector.load %arg2[%c0, %c0_0] : memref<8x32xf32, #tpu.memory_space<vmem>>, vector<8x32xf32>
    %1 = tpu.concatenate %0, %0 in 1 : vector<8x32xf32>, vector<8x32xf32> -> vector<8x64xf32>
    %c0_1 = arith.constant 0 : index
    %c0_2 = arith.constant 0 : index
    %2 = vector.load %arg1[%c0_1, %c0_2] : memref<8x64xf32, #tpu.memory_space<vmem>>, vector<8x64xf32>
    %3 = arith.addf %2, %1 : vector<8x64xf32>
    %c0_3 = arith.constant 0 : index
    %c0_4 = arith.constant 0 : index
    %4 = vector.load %arg3[%c0_3, %c0_4] : memref<8x64xf32, #tpu.memory_space<vmem>>, vector<8x64xf32>
    tpu.vector_store %arg3[%c0_3, %c0_4], %3 {strides = array<i32>} : memref<8x64xf32, #tpu.memory_space<vmem>>, vector<8x64xf32>,
    return
  }
  func.func @transform_0(%arg0: i32) -> (i32, i32) {
    %c0_i32 = arith.constant 0 : i32
    %c0_i32_0 = arith.constant 0 : i32
    return %arg0, %c0_i32 : i32, i32
  }
  func.func @transform_1(%arg0: i32) -> (i32, i32) {
    %c0_i32 = arith.constant 0 : i32
    %c0_i32_0 = arith.constant 0 : i32
    return %arg0, %c0_i32 : i32, i32
  }
  func.func @transform_2(%arg0: i32) -> (i32, i32) {
    %c0_i32 = arith.constant 0 : i32
    %c0_i32_0 = arith.constant 0 : i32
    return %arg0, %c0_i32 : i32, i32
  }
}

</mosaic_0001>

<bundles_post_ra>
// kernel: tpu_custom_call.1
= control target key start
LH: loop header
LB: loop body
LE: loop exit
PB: predicated region body
PF: predicated region fallthrough
CT: control target
= control target key end

     0   :  { %7 = vsyncpa [#allocation3], 0  ;;  %s194_s0 = inlined_call_operand.hbm [shape: f32[8,64], index: 0, kind: input, shape index: {}]   ;;  %s195_s1 = inlined_call_operand.hbm [shape: f32[8,32], index: 1, kind: input, shape index: {}]   ;;  %s196_s2 = inlined_call_operand.hbm [shape: f32[8,64], index: 2, kind: output, shape index: {}]  }
   0x1   :  { %8 = vsyncpa [#allocation6], 0 }
   0x2   :  { %9 = vsyncpa [#allocation4], 0  ;;  %s139_s9 = smov [#allocation2]   ;;  %s140_s11 = smov [#allocation5]  }
   0x3   :  { %s16_s10 = sshll.u32 %s139_s9, 4  ;;  %s26_s12 = sshll.u32 %s140_s11, 4  ;;  %s17_s10 = int_to_ptr.vmem [resolvable:$true] %s16_s10  ;;  %s27_s12 = int_to_ptr.vmem [resolvable:$true] %s26_s12 }
   0x4   :  { %s67_s15 = scalar_lea.hbm %s194_s0, 128 }
   0x5   :  { %p68_p0 = scmp.ne.s32.totalorder %s194_s0, %s67_s15  ;;  %p71_p1 = scmp.lt.u32.totalorder %s67_s15, %s194_s0 }
   0x7   :  { %p73_p2 = pnand %p71_p1, %p68_p0 }
   0x9   :  { %76 = shalt.err (!%p73_p2)
}
   0xa   :  { %s77_s20 = scalar_lea.vmem %s17_s10, 128  ;;  %p82_p4 = scmp.lt.s32.totalorder %s17_s10, %s17_s10 }
   0xb   :  { %p78_p3 = scmp.ne.s32.totalorder %s17_s10, %s77_s20  ;;  %p83_p5 = scmp.lt.s32.totalorder %s77_s20, %s77_s20 }
   0xd   :  { %p84_p6 = por %p83_p5, %p82_p4 }
   0xf   :  { %p85_p7 = pnand %p84_p6, %p78_p3 }
  0x11   :  { %88 = shalt.err (!%p85_p7)
}
  0x12   :  { %19 = dma.hbm_to_vmem [thread:$0]  %s194_s0, 128, %s17_s10, [#allocation3]  }
  0x13   :  { %s89_s25 = scalar_lea.hbm %s195_s1, 128 }
  0x14   :  { %p90_p8 = scmp.ne.s32.totalorder %s195_s1, %s89_s25  ;;  %p93_p9 = scmp.lt.u32.totalorder %s89_s25, %s195_s1 }
  0x16   :  { %p95_p10 = pnand %p93_p9, %p90_p8 }
  0x18   :  { %98 = shalt.err (!%p95_p10)
}
  0x19   :  { %s99_s30 = scalar_lea.vmem %s27_s12, 128  ;;  %p104_p12 = scmp.lt.s32.totalorder %s27_s12, %s27_s12 }
  0x1a   :  { %p100_p11 = scmp.ne.s32.totalorder %s27_s12, %s99_s30  ;;  %p105_p13 = scmp.lt.s32.totalorder %s99_s30, %s99_s30 }
  0x1c   :  { %p106_p0 = por %p105_p13, %p104_p12 }
  0x1e   :  { %p107_p1 = pnand %p106_p0, %p100_p11 }
  0x20   :  { %110 = shalt.err (!%p107_p1)
}
  0x21   :  { %29 = dma.hbm_to_vmem [thread:$0]  %s195_s1, 128, %s27_s12, [#allocation6]  }
  0x22   :  { %133 = dma.done.wait [#allocation3], 128  }
  0x23   :  { %134 = vsyncadd [#allocation3], 4294967168 }
  0x24   :  { %135 = dma.done.wait [#allocation6], 128  }
  0x25   :  { %136 = vsyncadd [#allocation6], 4294967168  ;;  %v36_v0 = vld [vmem:[#allocation5] sm:$0xff]  ;;  %s141_s4 = smov 32   ;;  %vm41_vm0 = vcmask 261120   ;;  %v43_v1 = vld [vmem:[#allocation2] sm:$0xff] }
  0x26   :  { %38 = vrot.lane.b32.xlu0 %v36_v0, %s141_s4  ;;  %s142_s5 = smov [#allocation7]   ;;  %vm45_vm1 = vcmask 523264  }
  0x27   :  { %s53_s6 = sshll.u32 %s142_s5, 4  ;;  %s54_s6 = int_to_ptr.vmem [resolvable:$true] %s53_s6 }
  0x28   :  { %s111_s7 = scalar_lea.vmem %s54_s6, 128  ;;  %p116_p3 = scmp.lt.s32.totalorder %s54_s6, %s54_s6 }
  0x29   :  { %p112_p2 = scmp.ne.s32.totalorder %s54_s6, %s111_s7  ;;  %p117_p4 = scmp.lt.s32.totalorder %s111_s7, %s111_s7 }
  0x2b   :  { %p118_p5 = por %p117_p4, %p116_p3 }
  0x2d   :  { %p119_p6 = pnand %p118_p5, %p112_p2 }
  0x98   :  { %v39_v2 = vpop.permute.xlu0 %38 }
  0x99   :  { %v42_v3 = vsel %vm41_vm0, %v36_v0, %v39_v2 }
  0x9a   :  { %v44_v4 = vadd.f32 %v43_v1, %v42_v3 }
  0x9c   :  { %46 = vst.msk [vmem:[#allocation7] sm:$0xff] %vm45_vm1, %v44_v4 }
  0x9d   :  { %122 = shalt.err (!%p119_p6)
}
  0x9e   :  { %s123_s9 = scalar_lea.hbm %s196_s2, 128 }
  0x9f   :  { %p124_p7 = scmp.ne.s32.totalorder %s196_s2, %s123_s9  ;;  %p127_p8 = scmp.lt.u32.totalorder %s123_s9, %s196_s2 }
  0xa1   :  { %p129_p9 = pnand %p127_p8, %p124_p7 }
  0xa3   :  { %132 = shalt.err (!%p129_p9)
}
  0xa4   :  { %56 = dma.vmem_to_hbm [thread:$0]  %s54_s6, 128, %s196_s2, [#allocation4]  }
  0xa5   :  { %137 = dma.done.wait [#allocation4], 128  }
  0xa6   :  { %138 = vsyncadd [#allocation4], 4294967168 }
  0xa7   :  { %60 = vsyncpa [#allocation3], 1 }
  0xa8   :  { %61 = vsyncpa [#allocation6], 1 }
  0xa9   :  { %62 = vsyncpa [#allocation4], 1 }

</bundles_post_ra>
